<compile_context>
chip_gen: v5e
topology: v5e:2x2
jax: 0.10.0
libtpu: 0.0.40
codegen_flags: <defaults>
</compile_context>

<pallas_src>
import functools
import math

import jax
import jax.numpy as jnp
from jax.experimental import pallas as pl
from jax.experimental.pallas import tpu as pltpu

# ---- module hyper-parameters (BesselBasis / PolynomialCutoff defaults) ----
R_MAX = 4.0        # cutoff radius
NUM_BASIS = 8      # number of Bessel basis functions
P = 6.0            # polynomial cutoff power


def _round_up(n, m):
    return ((n + m - 1) // m) * m


def _static_pow(x, p):
    """x**p for static p.  Integer p -> binary-exponentiation mul chain (VPU);
    non-integer p falls back to jnp.power (EUP exp/log)."""
    ip = int(p)
    if float(ip) == float(p) and ip >= 1:
        result = None
        base = x
        n = ip
        while n:
            if n & 1:
                result = base if result is None else result * base
            n >>= 1
            if n:
                base = base * base
        return result
    # TODO(synk): non-integer p has no cheap VPU form; uses transcendental pow.
    return jnp.power(x, p)


def _rbe_kernel(vec_ref, bw_ref, out_ref, *, r_max, p):
    """Per-tile: edge vectors (3, TE) -> fused (NB+1, TE) [embedding ; cutoff]."""
    v = vec_ref[...].astype(jnp.float32)                       # (3, TE)

    # squared length: explicit 3-term sublane unroll (pure VPU adds/muls).
    sq = v[0:1, :] * v[0:1, :] + v[1:2, :] * v[1:2, :] + v[2:3, :] * v[2:3, :]

    # edge length & reciprocal via a single rsqrt (EUP), no sqrt+divide.
    # NOTE: zero-length edges give NaN here, matching the reference module.
    inv_x = jax.lax.rsqrt(sq)                                  # 1 / ||v||   (1, TE)
    xf = sq * inv_x * (1.0 / r_max)                            # ||v||/r_max (1, TE)

    # --- PolynomialCutoff.forward (_poly_cutoff), p = 6 -> mul chain ---
    xf_p = _static_pow(xf, p)                                  # xf^p
    xf_p1 = xf_p * xf                                          # xf^(p+1)
    xf_p2 = xf_p1 * xf                                         # xf^(p+2)
    cutoff = (1.0
              - (p + 1.0) * (p + 2.0) / 2.0 * xf_p
              + p * (p + 2.0) * xf_p1
              - p * (p + 1.0) / 2.0 * xf_p2)
    cutoff = cutoff * (xf < 1.0).astype(jnp.float32)           # (1, TE)

    # --- BesselBasis.forward fused with the cutoff multiply ---
    # embedding = (2/r_max) * sin(w * x/r_max) * (1/x) * cutoff
    # Fold prefactor, 1/x and cutoff into one (1, TE) scale row -> a single
    # broadcast multiply per basis row instead of two.
    scale = cutoff * inv_x * (2.0 / r_max)                     # (1, TE)
    bw = bw_ref[...].astype(jnp.float32)                       # (NB, 1)
    nb = bw.shape[0]

    out_ref[0:nb, :] = (jnp.sin(bw * xf) * scale).astype(out_ref.dtype)
    out_ref[nb:nb + 1, :] = cutoff.astype(out_ref.dtype)       # cutoff row


def radial_basis_edge_encoding(edge_vec, bessel_weights, *, r_max=R_MAX, p=P,
                               tile_edges=32768):
    """edge_vec: (E, 3) f32; bessel_weights: (NUM_BASIS,) f32 (trainable param).

    Returns (edge_embedding (E, NUM_BASIS) f32, edge_cutoff (E, 1) f32).

    tile_edges is the lane-axis tile (rounded to a multiple of 128).  Default
    32768 -> ~3 MiB resident (double-buffered) per step, fits the scoped-VMEM
    default on v5e/v6e/v7x while keeping each grid step far above the per-step
    pipeline overhead.
    """
    E = edge_vec.shape[0]
    bw = jnp.asarray(bessel_weights, jnp.float32).reshape(-1, 1)   # (NB, 1)
    nb = bw.shape[0]

    # Tile on the lane axis: multiple of 128, no larger than the padded edge count.
    te = max(128, (min(int(tile_edges), _round_up(E, 128)) // 128) * 128)
    e_pad = _round_up(max(E, 1), te)

    # Lane-dense layout: edges on the last axis.  Pad with unit components so the
    # padded lanes have a safe non-zero length (their results are discarded).
    vec_t = jnp.transpose(edge_vec.astype(jnp.float32))            # (3, E)
    if e_pad != E:
        vec_t = jnp.pad(vec_t, ((0, 0), (0, e_pad - E)), constant_values=1.0)

    kernel = functools.partial(_rbe_kernel, r_max=float(r_max), p=float(p))

    fused = pl.pallas_call(
        kernel,
        out_shape=jax.ShapeDtypeStruct((nb + 1, e_pad), jnp.float32),
        grid_spec=pltpu.PrefetchScalarGridSpec(
            num_scalar_prefetch=0,
            grid=(e_pad // te,),
            in_specs=[
                pl.BlockSpec((3, te), lambda i: (0, i)),       # edge vectors
                pl.BlockSpec((nb, 1), lambda i: (0, 0)),       # bessel weights (resident)
            ],
            out_specs=pl.BlockSpec((nb + 1, te), lambda i: (0, i)),
        ),
        compiler_params=pltpu.CompilerParams(
            dimension_semantics=("parallel",)),
    )(vec_t, bw)

    # Layout plumbing back to the module's (E, NB) / (E, 1) convention.
    edge_embedding = jnp.transpose(fused[:nb, :E])                 # (E, NB)
    edge_cutoff = jnp.transpose(fused[nb:nb + 1, :E])              # (E, 1)
    return edge_embedding, edge_cutoff


def _reference(edge_vec, bessel_weights, r_max=R_MAX, p=P):
    """Plain-JAX reference mirroring the PyTorch forward."""
    x = jnp.linalg.norm(edge_vec, axis=-1)                         # (E,)
    xf = x * (1.0 / r_max)
    out = (1.0
           - (p + 1.0) * (p + 2.0) / 2.0 * jnp.power(xf, p)
           + p * (p + 2.0) * jnp.power(xf, p + 1.0)
           - p * (p + 1.0) / 2.0 * jnp.power(xf, p + 2.0))
    cutoff = (out * (xf < 1.0))[:, None]                           # (E, 1)
    numerator = jnp.sin(bessel_weights[None, :] * x[:, None] / r_max)
    basis = (2.0 / r_max) * (numerator / x[:, None])               # (E, NB)
    return basis * cutoff, cutoff


if __name__ == "__main__":
    key = jax.random.PRNGKey(0)
    k_pos, k_send, k_off = jax.random.split(key, 3)

    num_atoms = 16
    num_edges = 300   # deliberately not a multiple of 128 (exercises padding)

    # Deterministic synthetic graph.
    pos = jax.random.uniform(k_pos, (num_atoms, 3), jnp.float32,
                             minval=0.0, maxval=3.0)
    sender = jax.random.randint(k_send, (num_edges,), 0, num_atoms)
    offset = jax.random.randint(k_off, (num_edges,), 1, num_atoms)
    receiver = (sender + offset) % num_atoms   # sender != receiver -> length > 0

    # Glue: AtomicDataDict.with_edge_vectors (gather), stays in plain JAX.
    edge_vec = pos[receiver] - pos[sender]                         # (E, 3)

    # Deterministic parameter init (BesselBasis.__init__): n*pi, n = 1..num_basis.
    bessel_weights = (jnp.linspace(1.0, NUM_BASIS, NUM_BASIS, dtype=jnp.float32)
                      * math.pi)                                   # (NB,)

    # Small tile so the tiny test still runs a multi-step (grid=3) pipeline.
    emb, cutoff = radial_basis_edge_encoding(edge_vec, bessel_weights,
                                             tile_edges=128)
    emb = jax.block_until_ready(emb)
    cutoff = jax.block_until_ready(cutoff)

    emb_ref, cutoff_ref = _reference(edge_vec, bessel_weights)
    assert emb.shape == (num_edges, NUM_BASIS) and cutoff.shape == (num_edges, 1)
    # rsqrt + mul-chain powers differ from pow/sqrt by a few ulps -> 2e-5 tol.
    assert jnp.allclose(emb, emb_ref, atol=2e-5, rtol=2e-5)
    assert jnp.allclose(cutoff, cutoff_ref, atol=2e-5, rtol=2e-5)

    print("KERNEL_OK")
</pallas_src>

<mosaic_0001>
module attributes {stable_mosaic.version = 11 : i64} {
  func.func @_rbe_kernel(%arg0: i32, %arg1: memref<3x128xf32, #tpu.memory_space<vmem>>, %arg2: memref<8x1xf32, #tpu.memory_space<vmem>>, %arg3: memref<9x128xf32, #tpu.memory_space<vmem>>) attributes {dimension_semantics = [#tpu.dimension_semantics<parallel>], iteration_bounds = array<i64: 3>, scalar_prefetch = 0 : i64, scratch_operands = 0 : i64, tpu.core_type = #tpu.core_type<tc>, window_params = [{transform_indices = @transform_0, window_bounds = array<i64: 3, 128>}, {pipeline_mode = #tpu.pipeline_mode<synchronous>, transform_indices = @transform_1, window_bounds = array<i64: 8, 1>}, {transform_indices = @transform_2, window_bounds = array<i64: 9, 128>}]} {
    %c0 = arith.constant 0 : index
    %c0_0 = arith.constant 0 : index
    %0 = vector.load %arg1[%c0, %c0_0] : memref<3x128xf32, #tpu.memory_space<vmem>>, vector<3x128xf32>
    %1 = vector.extract_strided_slice %0 {offsets = [0, 0], sizes = [1, 128], strides = [1, 1]} : vector<3x128xf32> to vector<1x128xf32>
    %2 = vector.extract_strided_slice %0 {offsets = [0, 0], sizes = [1, 128], strides = [1, 1]} : vector<3x128xf32> to vector<1x128xf32>
    %3 = arith.mulf %1, %2 : vector<1x128xf32>
    %4 = vector.extract_strided_slice %0 {offsets = [1, 0], sizes = [1, 128], strides = [1, 1]} : vector<3x128xf32> to vector<1x128xf32>
    %5 = vector.extract_strided_slice %0 {offsets = [1, 0], sizes = [1, 128], strides = [1, 1]} : vector<3x128xf32> to vector<1x128xf32>
    %6 = arith.mulf %4, %5 : vector<1x128xf32>
    %7 = arith.addf %3, %6 : vector<1x128xf32>
    %8 = vector.extract_strided_slice %0 {offsets = [2, 0], sizes = [1, 128], strides = [1, 1]} : vector<3x128xf32> to vector<1x128xf32>
    %9 = vector.extract_strided_slice %0 {offsets = [2, 0], sizes = [1, 128], strides = [1, 1]} : vector<3x128xf32> to vector<1x128xf32>
    %10 = arith.mulf %8, %9 : vector<1x128xf32>
    %11 = arith.addf %7, %10 : vector<1x128xf32>
    %12 = math.rsqrt %11 : vector<1x128xf32>
    %13 = arith.mulf %11, %12 : vector<1x128xf32>
    %cst = arith.constant 2.500000e-01 : f32
    %14 = vector.broadcast %cst : f32 to vector<1x128xf32>
    %15 = arith.mulf %13, %14 : vector<1x128xf32>
    %16 = arith.mulf %15, %15 : vector<1x128xf32>
    %17 = arith.mulf %16, %16 : vector<1x128xf32>
    %18 = arith.mulf %16, %17 : vector<1x128xf32>
    %19 = arith.mulf %18, %15 : vector<1x128xf32>
    %20 = arith.mulf %19, %15 : vector<1x128xf32>
    %cst_1 = arith.constant 2.800000e+01 : f32
    %21 = vector.broadcast %cst_1 : f32 to vector<1x128xf32>
    %22 = arith.mulf %21, %18 : vector<1x128xf32>
    %cst_2 = arith.constant 1.000000e+00 : f32
    %23 = vector.broadcast %cst_2 : f32 to vector<1x128xf32>
    %24 = arith.subf %23, %22 : vector<1x128xf32>
    %cst_3 = arith.constant 4.800000e+01 : f32
    %25 = vector.broadcast %cst_3 : f32 to vector<1x128xf32>
    %26 = arith.mulf %25, %19 : vector<1x128xf32>
    %27 = arith.addf %24, %26 : vector<1x128xf32>
    %cst_4 = arith.constant 2.100000e+01 : f32
    %28 = vector.broadcast %cst_4 : f32 to vector<1x128xf32>
    %29 = arith.mulf %28, %20 : vector<1x128xf32>
    %30 = arith.subf %27, %29 : vector<1x128xf32>
    %cst_5 = arith.constant 1.000000e+00 : f32
    %31 = vector.broadcast %cst_5 : f32 to vector<1x128xf32>
    %32 = arith.cmpf olt, %15, %31 : vector<1x128xf32>
    %33 = arith.extui %32 : vector<1x128xi1> to vector<1x128xi32>
    %34 = arith.sitofp %33 : vector<1x128xi32> to vector<1x128xf32>
    %35 = arith.mulf %30, %34 : vector<1x128xf32>
    %36 = arith.mulf %35, %12 : vector<1x128xf32>
    %cst_6 = arith.constant 5.000000e-01 : f32
    %37 = vector.broadcast %cst_6 : f32 to vector<1x128xf32>
    %38 = arith.mulf %36, %37 : vector<1x128xf32>
    %c0_7 = arith.constant 0 : index
    %c0_8 = arith.constant 0 : index
    %39 = vector.load %arg2[%c0_7, %c0_8] : memref<8x1xf32, #tpu.memory_space<vmem>>, vector<8x1xf32>
    %40 = vector.broadcast %39 : vector<8x1xf32> to vector<8x128xf32>
    %41 = vector.broadcast %15 : vector<1x128xf32> to vector<8x128xf32>
    %42 = arith.mulf %40, %41 : vector<8x128xf32>
    %43 = math.sin %42 : vector<8x128xf32>
    %44 = vector.broadcast %38 : vector<1x128xf32> to vector<8x128xf32>
    %45 = arith.mulf %43, %44 : vector<8x128xf32>
    %c0_9 = arith.constant 0 : index
    %c0_10 = arith.constant 0 : index
    %46 = vector.load %arg3[%c0_9, %c0_10] : memref<9x128xf32, #tpu.memory_space<vmem>>, vector<8x128xf32>
    tpu.vector_store %arg3[%c0_9, %c0_10], %45 {strides = array<i32>} : memref<9x128xf32, #tpu.memory_space<vmem>>, vector<8x128xf32>,
    %c8 = arith.constant 8 : index
    %c0_11 = arith.constant 0 : index
    %47 = vector.load %arg3[%c8, %c0_11] : memref<9x128xf32, #tpu.memory_space<vmem>>, vector<1x128xf32>
    tpu.vector_store %arg3[%c8, %c0_11], %35 {strides = array<i32>} : memref<9x128xf32, #tpu.memory_space<vmem>>, vector<1x128xf32>,
    return
  }
  func.func @transform_0(%arg0: i32) -> (i32, i32) {
    %c0_i32 = arith.constant 0 : i32
    %c0_i32_0 = arith.constant 0 : i32
    return %c0_i32, %arg0 : i32, i32
  }
  func.func @transform_1(%arg0: i32) -> (i32, i32) {
    %c0_i32 = arith.constant 0 : i32
    %c0_i32_0 = arith.constant 0 : i32
    %c0_i32_1 = arith.constant 0 : i32
    return %c0_i32, %c0_i32_0 : i32, i32
  }
  func.func @transform_2(%arg0: i32) -> (i32, i32) {
    %c0_i32 = arith.constant 0 : i32
    %c0_i32_0 = arith.constant 0 : i32
    return %c0_i32, %arg0 : i32, i32
  }
}

</mosaic_0001>

<bundles_post_ra>
// kernel: tpu_custom_call.1
= control target key start
LH: loop header
LB: loop body
LE: loop exit
PB: predicated region body
PF: predicated region fallthrough
CT: control target
= control target key end

     0   :  { %7 = vsyncpa [#allocation3], 0  ;;  %s852_s0 = inlined_call_operand.hbm [shape: f32[3,384], index: 0, kind: input, shape index: {}]   ;;  %s853_s1 = inlined_call_operand.vmem [shape: f32[8,1], index: 1, kind: input, shape index: {}]   ;;  %s854_s2 = inlined_call_operand.hbm [shape: f32[9,384], index: 2, kind: output, shape index: {}]  }
   0x1   :  { %9 = vsyncpa [#allocation3 + $0x1], 0 }
   0x2   :  { %10 = vsyncpa [#allocation4], 0 }
   0x3   :  { %12 = vsyncpa [#allocation4 + $0x1], 0  ;;  %s654_s9 = smov 0   ;;  %s656_s10 = smov 0  }
   0x4   :  { %s658_s11 = smov 0   ;;  %s660_s12 = smov 0  }
   0x5 LB: > { %s675_s13 = sadd.s32 4294967295, %s626_s12   ;;  %s454_s14 = sadd.s32 4294967294, %s626_s12   ;;  %s626_s12 = sphi %s660_s12, %s863_s12   ;;  %s622_s11 = sphi %s658_s11, %s862_s11   ;;  %s618_s10 = sphi %s656_s10, %s861_s10   ;;  %s614_s9 = sphi %s654_s9, %s860_s9  }
   0x6   : > { %s679_s15 = sadd.s32 1, %s626_s12   ;;  %s25_s16 = sadd.s32 1, %s622_s11 }
   0x7   : > { %s22_s17 = ssub.s32 %s626_s12, %s679_s15  ;;  %p32_p0 = scmp.ne.s32.totalorder %s622_s11, %s618_s10 }
   0x8   : > { %p23_p1 = scmp.eq.s32.totalorder %s22_s17, 0  ;;  %p33_p2 = scmp.eq.s32.totalorder %s626_s12, 0 }
   0x9   : > { %p38_p3 = scmp.ne.s32.totalorder %s618_s10, %s614_s9  ;;  %p39_p4 = scmp.eq.s32.totalorder %s675_s13, 0 }
   0xa   : > { %s691_s18 = scalar_select %p23_p1, %s622_s11, %s25_s16  }
   0xb   : > { %p693_p5 = por %p33_p2, %p32_p0  ;;  %p697_p6 = por %p39_p4, %p38_p3 }
   0xc   : > { %p83_p7 = scmp.eq.s32.totalorder %s675_s13, 2  ;;  %p89_p8 = scmp.eq.s32.totalorder %s454_s14, 2 }
   0xd   : > { %p482_p9 = scmp.lt.s32.totalorder %s626_s12, 3  ;;  %s112_s23 = sand.u32 1, %s622_s11  }
   0xe   : > { %p703_p10 = por %p83_p7, %p32_p0  ;;  %p707_p11 = por %p89_p8, %p38_p3 }
   0xf   : > { %s458_s24 = sshll.u32 %s626_s12, 2  ;;  %s457_s25 = sshll.u32 %s112_s23, 2 }
  0x10   : > { %s120_s28 = scalar_lea.hbm %s852_s0, %s458_s24  ;;  %s116_s30 = scalar_lea.vmem [#allocation2], %s457_s25 }
  0x11   : > { %s122_s29 = sshll.u32 %s120_s28, 4  ;;  %s124_s3 = sshll.u32 %s116_s30, 4  ;;  %s123_s29 = int_to_ptr.hbm [resolvable:$true] %s122_s29  ;;  %s125_s3 = int_to_ptr.vmem [resolvable:$true] %s124_s3 }
  0x12   : > { %p718_p12 = pnand %p482_p9, %p693_p5  ;;  %p459_p13 = scmp.ge.s32.totalorder %s626_s12, 1 }
  0x13   : > { %p129_p0 = scmp.lt.s32.totalorder %s626_s12, 4  ;;  %s113_s5 = scalar_lea.sflag [#allocation3], %s112_s23 }
  0x14   : > { %s530_s6 = sshra.s32 %s123_s29, 4  ;;  %p534_p2 = pneg %p718_p12  ;;  %s531_s6 = int_to_ptr.hbm [resolvable:$true] %s530_s6 }
  0x15   : > { %s532_s7 = scalar_lea.hbm %s531_s6, 4  ;;  %s537_s16 = scalar_lea.hbm %s852_s0, 12 }
  0x16   : > { %p533_p1 = scmp.ne.s32.totalorder %s531_s6, %s532_s7  ;;  %p538_p5 = scmp.lt.s32.totalorder %s531_s6, %s852_s0 }
  0x17   : > { %p539_p7 = scmp.lt.s32.totalorder %s537_s16, %s532_s7 }
  0x18   : > { %p535_p3 = pnand %p534_p2, %p533_p1 }
  0x19   : > { %p540_p8 = por %p539_p7, %p538_p5 }
  0x1a   : > { %p536_p4 = pneg %p535_p3 }
  0x1c   : > { %p541_p9 = pnand %p540_p8, %p536_p4 }
  0x1e   : > { %544 = shalt.err (!%p541_p9)
}
  0x1f   : > { %477 = dma.hbm_to_vmem [thread:$0]  (!%p718_p12), %s123_s29, 64, %s125_s3, %s113_s5  }
  0x20   : > { %p130_p1 = pnand %p459_p13, %p129_p0 }
  0x21   : > { %s739_s23 = sand.u32 (!%p130_p1), 1, %s618_s10  }
  0x22   : > { %133 = sbr.rel (%p130_p1) target bundleno = 262 (0x106), region = 28  ;;  %s460_s24 = sshll.u32 (!%p130_p1), %s739_s23, 2 }
  0x23   : > { %s136_s25 = scalar_lea.sflag (!%p130_p1), [#allocation3], %s739_s23  ;;  %s139_s26 = scalar_lea.vmem (!%p130_p1), [#allocation2], %s460_s24 }
  0x27   : > { %605 = dma.done.wait (%p697_p6), %s136_s25, 64  }
  0x28   : > { %607 = vsyncadd (%p697_p6), %s136_s25, 4294967232  ;;  %v628_v0 = vmov 0   ;;  %v161_v1 = vld [vmem:[%s139_s26] sm:$0x7]  ;;  %s461_s20 = sshll.u32 %s739_s23, 4  ;;  %v629_v27 = vmov 0.0  }
  0x29   : > { %527 = vset.pattern.permute.xlu0 %v628_v0  ;;  %v199_v2 = vld [vmem:[%s853_s1] sm:$0xff]  ;;  %v162_v3 = vmul.f32 %v161_v1, %v161_v1  ;;  %s754_s29 = scalar_lea.vmem [#allocation5], %s461_s20  ;;  %v630_v46 = vmov 683565275   ;;  %v631_v48 = vmov 2475754826  }
  0x2a   : > { %202 = vperm.xlu0 %527, %v199_v2   ;;  %v632_v51 = vmov 2131351028   ;;  %v633_v54 = vmov 2102212464   ;;  %v634_v57 = vmov 920167782  }
  0x2b   : > { %v164_v4 = vrot.slane %v162_v3, 1  ;;  %v167_v5 = vrot.slane %v162_v3, 2  ;;  %v635_v60 = vmov 1326507024   ;;  %s467_s30 = sshll.u32 %s675_s13, 3  ;;  %s378_s6 = sshll.u32 %s754_s29, 4  ;;  %s379_s6 = int_to_ptr.vmem [resolvable:$true] %s378_s6 }
  0x2c   : > { %s377_s5 = scalar_lea.hbm %s854_s2, %s467_s30  ;;  %s367_s13 = scalar_lea.sflag [#allocation4], %s739_s23 }
  0x2d   : > { %v166_v6 = vadd.f32 %v164_v4, %v162_v3  ;;  %s380_s7 = sshll.u32 %s377_s5, 4  ;;  %s580_s19 = scalar_lea.hbm %s854_s2, 48  ;;  %s381_s7 = int_to_ptr.hbm [resolvable:$true] %s380_s7 }
  0x2e   : > { %s574_s8 = sshra.s32 %s381_s7, 4  ;;  %s575_s8 = int_to_ptr.hbm [resolvable:$true] %s574_s8 }
  0x2f   : > { %v169_v7 = vadd.f32 %v167_v5, %v166_v6  ;;  %s576_s14 = scalar_lea.hbm %s575_s8, 16  ;;  %p581_p0 = scmp.lt.s32.totalorder %s575_s8, %s854_s2 }
  0x30   : > { %p577_p6 = scmp.ne.s32.totalorder %s575_s8, %s576_s14  ;;  %p582_p2 = scmp.lt.s32.totalorder %s580_s19, %s576_s14 }
  0x31   : > { %528 = vrsqrt.f32 %v169_v7  ;;  %vm176_vm0 = vweird.f32 %v169_v7 }
  0x32   : > { %p578_p12 = pnand %p577_p6, %p703_p10  ;;  %p583_p3 = por %p582_p2, %p581_p0 }
  0x34   : > { %p579_p13 = pneg %p578_p12 }
  0x36   : > { %p584_p4 = pnand %p583_p3, %p579_p13 }
  0x37   : > { %v529_v8 = vpop.eup %528 }
  0x38   : > { %v171_v9 = vmul.f32 %v529_v8, %v169_v7  ;;  %vm177_vm1 = vweird.f32 %v529_v8 }
  0x39   : > { %vm178_vm2 = vmor %vm176_vm0, %vm177_vm1 }
  0x3a   : > { %v172_v10 = vmul.f32 %v529_v8, %v171_v9 }
  0x3c   : > { %v173_v11 = vmul.f32 0.5, %v172_v10 }
  0x3e   : > { %v174_v12 = vsub.f32 1.5, %v173_v11 }
  0x40   : > { %v175_v13 = vmul.f32 %v529_v8, %v174_v12 }
  0x42   : > { %v179_v14 = vsel %vm178_vm2, %v529_v8, %v175_v13 }
  0x43   : > { %v180_v15 = vmul.f32 %v179_v14, %v169_v7 }
  0x45   : > { %v181_v16 = vmul.f32 0.25, %v180_v15 }
  0x47   : > { %v182_v17 = vmul.f32 %v181_v16, %v181_v16  ;;  %vm193_vm3 = vcmp.lt.f32.partialorder %v181_v16, 1.0  ;;  %v205_v32 = vperm.slane %v181_v16, 0 }
  0x48   : > { %v462_v28 = vsel %vm193_vm3, 1.0, %v629_v27 }
  0x49   : > { %v183_v18 = vmul.f32 %v182_v17, %v182_v17 }
  0x4b   : > { %v184_v19 = vmul.f32 %v183_v18, %v182_v17 }
  0x4d   : > { %v185_v20 = vmul.f32 %v184_v19, %v181_v16  ;;  %v187_v21 = vmul.f32 28.0, %v184_v19 }
  0x4f   : > { %v186_v22 = vmul.f32 %v185_v20, %v181_v16  ;;  %v188_v23 = vsub.f32 1.0, %v187_v21  ;;  %v189_v24 = vmul.f32 48.0, %v185_v20 }
  0x51   : > { %v190_v25 = vadd.f32 %v189_v24, %v188_v23  ;;  %v191_v26 = vmul.f32 21.0, %v186_v22 }
  0x53   : > { %v192_v29 = vsub.f32 %v190_v25, %v191_v26 }
  0x55   : > { %v196_v30 = vmul.f32 %v462_v28, %v192_v29 }
  0x57   : > { %v752_v31 = vmul.f32 %v196_v30, %v179_v14  ;;  %365 = vst [vmem:[%s754_s29 + $0x8] sm:$0x1] %v196_v30 }
  0x9c   : > { %v203_v33 = vpop.permute.xlu0 %202 }
  0x9d   : > { %v757_v34 = vmul.f32 %v205_v32, %v203_v33 }
  0x9f   : > { %v210_v35 = vand.u32 2139095040, %v757_v34  ;;  %v207_v38 = vand.u32 2147483647, %v757_v34  ;;  %vm209_vm0 = vcmp.lt.s32.totalorder %v757_v34, 0 }
  0xa1   : > { %v211_v36 = vshrl.u32 %v210_v35, 23  ;;  %v214_v40 = vand.u32 8388607, %v207_v38  ;;  %vm208_vm1 = vcmp.le.f32.partialorder %v207_v38, 0.7853982 }
  0xa3   : > { %v463_v37 = vadd.s32 4294967169, %v211_v36  ;;  %v215_v44 = vor.u32 8388608, %v214_v40 }
  0xa5   : > { %v217_v39 = vadd.s32 1, %v463_v37  ;;  %v774_v4 = vshll.u32 %v215_v44, 8 }
  0xa7   : > { %vm218_vm4 = vcmp.gt.s32.totalorder %v217_v39, 0  ;;  %v256_v13 = vand.u32 65535, %v774_v4  ;;  %v257_v14 = vshrl.u32 %v774_v4, 16 }
  0xa8   : > { %v219_v41 = vsel %vm218_vm4, %v217_v39, 0 }
  0xa9   : > { %v221_v42 = vand.u32 31, %v219_v41  ;;  %v765_v45 = vshrl.u32 %v219_v41, 5 }
  0xab   : > { %v763_v43 = vsub.s32 32, %v221_v42  ;;  %v224_v47 = vshll.u32 %v630_v46, %v221_v42  ;;  %v227_v49 = vshll.u32 %v631_v48, %v221_v42  ;;  %v230_v53 = vshll.u32 %v632_v51, %v221_v42 }
  0xac   : > { %v233_v56 = vshll.u32 %v633_v54, %v221_v42  ;;  %v236_v59 = vshll.u32 %v634_v57, %v221_v42  ;;  %vm239_vm5 = vcmp.lt.s32.totalorder %v765_v45, 1  ;;  %vm242_vm6 = vcmp.lt.s32.totalorder %v765_v45, 4 }
  0xad   : > { %v225_v50 = vshrl.u32 %v631_v48, %v763_v43  ;;  %v228_v52 = vshrl.u32 %v632_v51, %v763_v43  ;;  %v231_v55 = vshrl.u32 %v633_v54, %v763_v43  ;;  %v234_v58 = vshrl.u32 %v634_v57, %v763_v43 }
  0xae   : > { %v237_v61 = vshrl.u32 %v635_v60, %v763_v43  ;;  %vm241_vm7 = vcmp.lt.s32.totalorder %v765_v45, 3  ;;  %vm240_vm8 = vcmp.lt.s32.totalorder %v765_v45, 2  ;;  %v223_v42 = vshrl.u32 %v630_v46, %v763_v43 }
  0xaf   : > { %v226_v62 = vor.u32 %v225_v50, %v224_v47  ;;  %v229_v63 = vor.u32 %v228_v52, %v227_v49  ;;  %v232_v1 = vor.u32 %v231_v55, %v230_v53  ;;  %v235_v2 = vor.u32 %v234_v58, %v233_v56 }
  0xb0   : > { %v238_v3 = vor.u32 %v237_v61, %v236_v59 }
  0xb1   : > { %v247_v5 = vsel %vm239_vm5, %v226_v62, %v229_v63  ;;  %v251_v6 = vsel %vm239_vm5, %v229_v63, %v232_v1  ;;  %v248_v7 = vsel %vm242_vm6, %v235_v2, 920167782  ;;  %v244_v39 = vsel %vm242_vm6, %v232_v1, 2102212464 }
  0xb2   : > { %v252_v8 = vsel %vm242_vm6, %v238_v3, 1326507024  ;;  %v249_v9 = vsel %vm241_vm7, %v232_v1, %v248_v7  ;;  %v243_v51 = vsel %vm239_vm5, %v223_v42, %v226_v62  ;;  %v245_v52 = vsel %vm241_vm7, %v229_v63, %v244_v39 }
  0xb3   : > { %v253_v10 = vsel %vm241_vm7, %v235_v2, %v252_v8  ;;  %v250_v11 = vsel %vm240_vm8, %v247_v5, %v249_v9  ;;  %v246_v43 = vsel %vm240_vm8, %v243_v51, %v245_v52  ;;  %vm350_vm5 = vweird.f32 %v757_v34 }
  0xb4   : > { %v254_v12 = vsel %vm240_vm8, %v251_v6, %v253_v10  ;;  %v280_v17 = vand.u32 65535, %v250_v11  ;;  %v281_v18 = vshrl.u32 %v250_v11, 16  ;;  %v300_v59 = vmul.u32 %v774_v4, %v246_v43 }
  0xb5   : > { %v258_v15 = vand.u32 65535, %v254_v12  ;;  %v259_v16 = vshrl.u32 %v254_v12, 16 }
  0xb6   : > { %v283_v21 = vmul.u32 %v281_v18, %v256_v13  ;;  %v284_v22 = vmul.u32 %v280_v17, %v257_v14  ;;  %v282_v26 = vmul.u32 %v280_v17, %v256_v13  ;;  %v285_v30 = vmul.u32 %v281_v18, %v257_v14 }
  0xb7   : > { %v261_v19 = vmul.u32 %v259_v16, %v256_v13  ;;  %v262_v20 = vmul.u32 %v258_v15, %v257_v14  ;;  %v260_v23 = vmul.u32 %v258_v15, %v256_v13  ;;  %v263_v25 = vmul.u32 %v259_v16, %v257_v14 }
  0xb8   : > { %v286_v27 = vshll.u32 %v283_v21, 16  ;;  %v288_v33 = vshll.u32 %v284_v22, 16  ;;  %v287_v49 = vshrl.u32 %v283_v21, 16  ;;  %v289_v55 = vshrl.u32 %v284_v22, 16 }
  0xb9   : > { %v264_v24 = vshll.u32 %v261_v19, 16  ;;  %v266_v28 = vshll.u32 %v262_v20, 16  ;;  %v265_v44 = vshrl.u32 %v261_v19, 16  ;;  %v267_v53 = vshrl.u32 %v262_v20, 16 }
  0xba   : > { %vm290_vm10 = vc.u32 %v282_v26, %v286_v27  ;;  %v292_v35 = vadd.s32 %v286_v27, %v282_v26 }
  0xbb   : > { %vm268_vm9 = vc.u32 %v260_v23, %v264_v24  ;;  %v270_v29 = vadd.s32 %v264_v24, %v260_v23  ;;  %v291_v37 = vsel %vm290_vm10, 1, %v628_v0 }
  0xbc   : > { %v269_v32 = vsel %vm268_vm9, 1, %v628_v0  ;;  %v293_v41 = vadd.s32 %v291_v37, %v285_v30  ;;  %vm294_vm12 = vc.u32 %v292_v35, %v288_v33  ;;  %v296_v58 = vadd.s32 %v292_v35, %v288_v33 }
  0xbd   : > { %v271_v36 = vadd.s32 %v269_v32, %v263_v25  ;;  %vm272_vm11 = vc.u32 %v270_v29, %v266_v28  ;;  %v295_v48 = vsel %vm294_vm12, 1, %v628_v0 }
  0xbe   : > { %v273_v40 = vsel %vm272_vm11, 1, %v628_v0  ;;  %v297_v50 = vadd.s32 %v295_v48, %v293_v41  ;;  %v198_v41 = vmul.f32 0.5, %v752_v31 }
  0xbf   : > { %v275_v47 = vadd.s32 %v273_v40, %v271_v36 }
  0xc0   : > { %v298_v56 = vadd.s32 %v297_v50, %v287_v49  ;;  %v362_v49 = vperm.slane %v198_v41, 0 }
  0xc1   : > { %v276_v54 = vadd.s32 %v275_v47, %v265_v44 }
  0xc2   : > { %v299_v46 = vadd.s32 %v298_v56, %v289_v55 }
  0xc3   : > { %v277_v57 = vadd.s32 %v276_v54, %v267_v53 }
  0xc4   : > { %v303_v0 = vadd.s32 1, %v299_v46 }
  0xc5   : > { %vm302_vm13 = vc.u32 %v277_v57, %v296_v58  ;;  %v301_v45 = vadd.s32 %v296_v58, %v277_v57 }
  0xc6   : > { %v304_v60 = vsel %vm302_vm13, %v303_v0, %v299_v46 }
  0xc7   : > { %v305_v61 = vadd.s32 %v304_v60, %v300_v59 }
  0xc9   : > { %v306_v62 = vadd.s32 536870912, %v305_v61 }
  0xcb   : > { %v307_v1 = vshrl.u32 %v306_v62, 30 }
  0xcd   : > { %v308_v2 = vshll.u32 %v307_v1, 30  ;;  %v331_v21 = vsub.s32 4, %v307_v1 }
  0xcf   : > { %v309_v63 = vsub.s32 %v305_v61, %v308_v2  ;;  %v332_v26 = vsel %vm209_vm0, %v331_v21, %v307_v1 }
  0xd0   : > { %v334_v29 = vsel %vm208_vm1, 0, %v332_v26 }
  0xd1   : > { %vm310_vm14 = vcmp.lt.s32.totalorder %v309_v63, 0  ;;  %v311_v3 = vsub.s32 0, %v309_v63  ;;  %v351_v36 = vadd.s32 3, %v334_v29 }
  0xd3   : > { %v312_v5 = vsel %vm310_vm14, %v311_v3, %v309_v63  ;;  %v352_v42 = vand.u32 3, %v351_v36 }
  0xd4   : > { %v313_v6 = vclz %v312_v5 }
  0xd5   : > { %vm354_vm2 = vcmp.eq.s32.totalorder %v352_v42, 0  ;;  %vm357_vm3 = vcmp.eq.s32.totalorder %v352_v42, 2  ;;  %vm353_vm4 = vcmp.lt.s32.totalorder %v352_v42, 2 }
  0xd6   : > { %v464_v7 = vadd.s32 4294967294, %v313_v6 }
  0xd8   : > { %vm465_vm15 = vcmp.lt.s32.totalorder %v464_v7, 0 }
  0xd9   : > { %v316_v8 = vsel %vm465_vm15, 0, %v464_v7 }
  0xda   : > { %v317_v9 = vsub.s32 32, %v316_v8  ;;  %v321_v10 = vsub.s32 4294967266, %v316_v8  ;;  %v318_v11 = vshll.u32 %v309_v63, %v316_v8 }
  0xdc   : > { %v319_v12 = vshrl.u32 %v301_v45, %v317_v9  ;;  %v322_v13 = vadd.s32 127, %v321_v10 }
  0xde   : > { %v320_v4 = vor.u32 %v319_v12, %v318_v11  ;;  %v323_v14 = vshll.u32 %v322_v13, 23 }
  0xe0   : > { %v324_v15 = vor.u32 4788187, %v323_v14  ;;  %v327_v17 = vcvt.s32.f32 %v320_v4 }
  0xe2   : > { %v325_v16 = vand.u32 2147483647, %v324_v15 }
  0xe4   : > { %v328_v18 = vmul.f32 %v327_v17, %v325_v16 }
  0xe6   : > { %v329_v19 = vxor.u32 2147483648, %v328_v18 }
  0xe8   : > { %v330_v20 = vsel %vm209_vm0, %v329_v19, %v328_v18 }
  0xe9   : > { %v333_v22 = vsel %vm208_vm1, %v757_v34, %v330_v20 }
  0xea   : > { %v335_v23 = vmul.f32 %v333_v22, %v333_v22 }
  0xec   : > { %v336_v24 = vmul.f32 -0.001358992, %v335_v23  ;;  %v343_v25 = vmul.f32 -0.00019511016, %v335_v23 }
  0xee   : > { %v337_v27 = vadd.f32 0.041655596, %v336_v24  ;;  %v344_v28 = vadd.f32 0.008332121, %v343_v25 }
  0xf0   : > { %v338_v30 = vmul.f32 %v337_v27, %v335_v23  ;;  %v345_v32 = vmul.f32 %v344_v28, %v335_v23 }
  0xf2   : > { %v339_v33 = vadd.f32 -0.4999988, %v338_v30  ;;  %v346_v35 = vadd.f32 -0.16666654, %v345_v32 }
  0xf4   : > { %v340_v37 = vmul.f32 %v339_v33, %v335_v23  ;;  %v347_v38 = vmul.f32 %v346_v35, %v335_v23 }
  0xf6   : > { %v341_v39 = vadd.f32 1.0, %v340_v37  ;;  %v348_v40 = vadd.f32 1.0, %v347_v38 }
  0xf8   : > { %v349_v44 = vmul.f32 %v348_v40, %v333_v22  ;;  %v358_v47 = vxor.u32 2147483648, %v341_v39 }
  0xfa   : > { %v355_v48 = vxor.u32 2147483648, %v349_v44  ;;  %v359_v51 = vsel %vm357_vm3, %v358_v47, %v349_v44 }
  0xfc   : > { %v356_v50 = vsel %vm354_vm2, %v341_v39, %v355_v48 }
  0xfd   : > { %v360_v31 = vsel %vm353_vm4, %v356_v50, %v359_v51 }
  0xfe   : > { %v361_v52 = vsel %vm350_vm5, nan, %v360_v31 }
  0xff   : > { %v363_v53 = vmul.f32 %v362_v49, %v361_v52 }
 0x101   : > { %364 = vst [vmem:[%s754_s29] sm:$0xff] %v363_v53 }
 0x102   : > { %587 = shalt.err (!%p584_p4)
}
 0x103   : > { %s636_s23 = smov 128   ;;  %s637_s26 = smov 384  }
 0x104   : > { %s638_s27 = smov 8  }
 0x105   : > { %472 = dma.vmem_to_hbm [thread:$0]  (%p703_p10), %s379_s6, 256, %s381_s7, %s367_s13, %s636_s23, %s637_s26, %s638_s27  }
 0x106 PF: > { %p483_p5 = scmp.ge.s32.totalorder %s626_s12, 2  ;;  %s395_s28 = sand.u32 1, %s614_s9  }
 0x107   : > { %s396_s20 = scalar_lea.sflag [#allocation4], %s395_s28 }
 0x108   : > { %p479_p7 = pnand %p483_p5, %p707_p11 }
 0x10a   : > { %p480_p8 = pneg %p479_p7 }
 0x10c   : > { %609 = dma.done.wait (%p480_p8), %s396_s20, 256  }
 0x10d   : > { %611 = vsyncadd (%p480_p8), %s396_s20, 4294967040  ;;  %p15_p9 = scmp.ge.s32.totalorder %s679_s15, 5   ;;  %s860_s9 = smov %s618_s10 }
 0x10e   : > { %s861_s10 = smov %s622_s11  ;;  %s862_s11 = smov %s691_s18 }
 0x10f   : > { %s863_s12 = smov %s679_s15  ;;  %17 = sbr.rel (!%p15_p9) target bundleno = 5 (0x5), region = 73 }
 0x114   :  { %402 = vsyncpa [#allocation3], 1 }
 0x115   :  { %404 = vsyncpa [#allocation3 + $0x1], 1 }
 0x116   :  { %405 = vsyncpa [#allocation4], 1 }
 0x117   :  { %407 = vsyncpa [#allocation4 + $0x1], 1 }

</bundles_post_ra>
